<compile_context>
chip_gen: v5e
topology: v5e:2x2
jax: 0.10.0
libtpu: 0.0.40
codegen_flags: <defaults>
</compile_context>

<pallas_src>
import functools
import math

import jax
import jax.numpy as jnp
from jax.experimental import pallas as pl
from jax.experimental.pallas import tpu as pltpu


def _fused_lstm_kernel(x0_ref, h_prev_ref, c_prev_ref, w_ref, b_ref,
                       h_out_ref, c_out_ref, y_ref, xh_ref,
                       *, hidden_dim, input_dim, d_xmax):
    """One grid step == one LSTM layer.

    x0_ref     : (B, input_dim)     network input (resident across all layers)
    h_prev_ref : (1, B, H)          previous hidden state of this layer
    c_prev_ref : (1, B, H)          previous cell state of this layer
    w_ref      : (1, K, 4H)  bf16   stacked [W_ih^T (padded to d_xmax rows); W_hh^T]
    b_ref      : (1, 1, 4H)  f32    b_ih + b_hh
    h_out_ref  : (1, B, H)          new hidden state (aliased with h_prev input)
    c_out_ref  : (1, B, H)          new cell state  (aliased with c_prev input)
    y_ref      : (B, H)             top-layer output (VMEM-resident, written back once)
    xh_ref     : (B, K)  f32 VMEM   [x ; h] concat buffer; cols [:d_xmax] carry the
                                    layer-to-layer activation, cols [d_xmax:] hold h.
    """
    layer = pl.program_id(0)
    H = hidden_dim

    @pl.when(layer == 0)
    def _():
        # Zero the whole concat buffer (kills any stale/NaN VMEM contents in the
        # padded lanes), then drop the network input into the x region.
        xh_ref[...] = jnp.zeros_like(xh_ref)
        xh_ref[:, :input_dim] = x0_ref[...]

    # Previous hidden state of this layer goes into the h region of the concat buffer.
    xh_ref[:, d_xmax:] = h_prev_ref[0]

    xh = xh_ref[...]                                  # (B, K) f32
    # Single MXU matmul: bf16 operands, f32 accumulate.  Zero weight rows make the
    # padded x lanes contribute nothing.
    gates = (jnp.dot(xh.astype(w_ref.dtype), w_ref[0],
                     preferred_element_type=jnp.float32)
             + b_ref[0])                              # (B, 4H) f32

    # One sigmoid over the full 4H(=128-lane) tile, one tanh on the g slice.
    s = jax.nn.sigmoid(gates)
    g = jnp.tanh(gates[:, 2 * H:3 * H])
    i = s[:, 0 * H:1 * H]
    f = s[:, 1 * H:2 * H]
    o = s[:, 3 * H:4 * H]

    c_new = f * c_prev_ref[0] + i * g
    h_new = o * jnp.tanh(c_new)

    h_out_ref[0] = h_new.astype(h_out_ref.dtype)
    c_out_ref[0] = c_new.astype(c_out_ref.dtype)
    # Top-layer output: resident block, only the last layer's value hits HBM.
    y_ref[...] = h_new.astype(y_ref.dtype)
    # Carry: this layer's h is the next layer's x.
    xh_ref[:, :H] = h_new


@functools.partial(jax.jit, donate_argnums=(1, 2))
def _lstm_controller_step(x, h_prev, c_prev, w_cat, b_cat):
    """Fused multi-layer LSTM cell step. Returns (top_output, h_new, c_new)."""
    L, B, H = h_prev.shape
    input_dim = x.shape[1]
    K = w_cat.shape[1]
    d_xmax = K - H

    kernel = functools.partial(_fused_lstm_kernel, hidden_dim=H,
                               input_dim=input_dim, d_xmax=d_xmax)

    grid_spec = pltpu.PrefetchScalarGridSpec(
        num_scalar_prefetch=0,
        grid=(L,),
        in_specs=[
            pl.BlockSpec((B, input_dim), lambda l: (0, 0)),      # x0 (resident)
            pl.BlockSpec((1, B, H), lambda l: (l, 0, 0)),        # h_prev[l]
            pl.BlockSpec((1, B, H), lambda l: (l, 0, 0)),        # c_prev[l]
            pl.BlockSpec((1, K, 4 * H), lambda l: (l, 0, 0)),    # stacked weights[l]
            pl.BlockSpec((1, 1, 4 * H), lambda l: (l, 0, 0)),    # bias[l]
        ],
        out_specs=[
            pl.BlockSpec((1, B, H), lambda l: (l, 0, 0)),        # h_new[l]
            pl.BlockSpec((1, B, H), lambda l: (l, 0, 0)),        # c_new[l]
            pl.BlockSpec((B, H), lambda l: (0, 0)),              # top-layer output
        ],
        scratch_shapes=[pltpu.VMEM((B, K), jnp.float32)],        # [x ; h] carry buffer
    )

    h_new, c_new, y = pl.pallas_call(
        kernel,
        grid_spec=grid_spec,
        out_shape=(
            jax.ShapeDtypeStruct((L, B, H), jnp.float32),
            jax.ShapeDtypeStruct((L, B, H), jnp.float32),
            jax.ShapeDtypeStruct((B, H), jnp.float32),
        ),
        # Update (h, c) in place across controller steps (P8): h_prev->h_new, c_prev->c_new.
        input_output_aliases={1: 0, 2: 1},
        compiler_params=pltpu.CompilerParams(
            dimension_semantics=("arbitrary",)),                 # layer axis is a carried dep
    )(x, h_prev, c_prev, w_cat, b_cat)
    return y, h_new, c_new


class LSTMControllerPallas:
    """JAX/Pallas equivalent of the PyTorch LSTMController (single-timestep forward)."""

    def __init__(self, input_dim, hidden_dim, num_layers=1, key=None):
        self.input_dim = input_dim
        self.hidden_dim = hidden_dim
        self.num_layers = num_layers
        self.d_xmax = max(input_dim, hidden_dim)   # x region width in the concat buffer
        self.k_dim = self.d_xmax + hidden_dim      # contraction dim of the fused matmul

        if key is None:
            key = jax.random.PRNGKey(0)

        # reset_parameters()-style init: weights ~ U(-stdev, stdev), biases = 0.
        stdev = 5.0 / math.sqrt(input_dim + hidden_dim)
        w_layers = []
        for layer in range(num_layers):
            d_in = input_dim if layer == 0 else hidden_dim
            key, k1, k2 = jax.random.split(key, 3)
            w_ih_t = jax.random.uniform(k1, (d_in, 4 * hidden_dim),
                                        jnp.float32, -stdev, stdev)
            w_hh_t = jax.random.uniform(k2, (hidden_dim, 4 * hidden_dim),
                                        jnp.float32, -stdev, stdev)
            # Stacked layout: rows [0:d_in] = W_ih^T, rows [d_in:d_xmax] = 0 (padding),
            # rows [d_xmax:K] = W_hh^T.  Zero rows make padded input lanes inert.
            w = jnp.zeros((self.k_dim, 4 * hidden_dim), jnp.float32)
            w = w.at[:d_in, :].set(w_ih_t)
            w = w.at[self.d_xmax:, :].set(w_hh_t)
            w_layers.append(w)

        # bf16 weights: MXU-native on all generations, halves weight DMA per step.
        self.w_cat = jnp.stack(w_layers, axis=0).astype(jnp.bfloat16)      # (L, K, 4H)
        # Combined b_ih + b_hh (zero-init), kept in f32.
        self.b_cat = jnp.zeros((num_layers, 1, 4 * hidden_dim), jnp.float32)

        # register_buffer('lstm_h_bias'/'lstm_c_bias', zeros(num_layers, 1, H))
        self.lstm_h_bias = jnp.zeros((num_layers, 1, hidden_dim), jnp.float32)
        self.lstm_c_bias = jnp.zeros((num_layers, 1, hidden_dim), jnp.float32)

    def init_state(self, batch_size):
        h = jnp.tile(self.lstm_h_bias, (1, batch_size, 1))
        c = jnp.tile(self.lstm_c_bias, (1, batch_size, 1))
        return (h, c)

    def forward(self, inputs, pre_state):
        """inputs: (batch, input_dim); pre_state: (h, c), each (num_layers, batch, hidden).

        NOTE: the state buffers are donated (updated in place); do not reuse
        `pre_state` after this call."""
        h_prev, c_prev = pre_state
        y, h_new, c_new = _lstm_controller_step(inputs, h_prev, c_prev,
                                                self.w_cat, self.b_cat)
        return y, (h_new, c_new)


def _reference_forward(ctrl, inputs, pre_state):
    """Pure-JAX reference mirroring the kernel's precision (bf16 matmul, f32 math)."""
    h_prev, c_prev = pre_state
    H = ctrl.hidden_dim
    d_xmax = ctrl.d_xmax
    x = inputs
    hs, cs = [], []
    for layer in range(ctrl.num_layers):
        w = ctrl.w_cat[layer]          # (K, 4H) bf16
        b = ctrl.b_cat[layer]          # (1, 4H) f32
        x_pad = jnp.zeros((x.shape[0], d_xmax), jnp.float32).at[:, :x.shape[1]].set(x)
        xh = jnp.concatenate([x_pad, h_prev[layer]], axis=1)
        gates = jnp.dot(xh.astype(w.dtype), w,
                        preferred_element_type=jnp.float32) + b
        i = jax.nn.sigmoid(gates[:, 0 * H:1 * H])
        f = jax.nn.sigmoid(gates[:, 1 * H:2 * H])
        g = jnp.tanh(gates[:, 2 * H:3 * H])
        o = jax.nn.sigmoid(gates[:, 3 * H:4 * H])
        c_new = f * c_prev[layer] + i * g
        h_new = o * jnp.tanh(c_new)
        hs.append(h_new)
        cs.append(c_new)
        x = h_new
    return x, (jnp.stack(hs, 0), jnp.stack(cs, 0))


if __name__ == "__main__":
    batch = 2
    input_dim = 16
    hidden_dim = 32
    num_layers = 2

    key = jax.random.PRNGKey(0)
    key, k_in = jax.random.split(key)

    ctrl = LSTMControllerPallas(input_dim, hidden_dim, num_layers, key=key)
    inputs = jax.random.normal(k_in, (batch, input_dim), jnp.float32)

    # Reference first (the Pallas path donates/aliases its state buffers).
    ref_state = ctrl.init_state(batch)
    ref_out, (ref_h, ref_c) = _reference_forward(ctrl, inputs, ref_state)

    pre_state = ctrl.init_state(batch)
    outputs, (h_new, c_new) = ctrl.forward(inputs, pre_state)
    jax.block_until_ready((outputs, h_new, c_new))

    assert outputs.shape == (batch, hidden_dim)
    assert h_new.shape == (num_layers, batch, hidden_dim)
    assert c_new.shape == (num_layers, batch, hidden_dim)
    # bf16 weights -> loosened tolerance (reference uses the same bf16 cast path).
    assert jnp.allclose(outputs, ref_out, atol=1e-2, rtol=1e-2)
    assert jnp.allclose(h_new, ref_h, atol=1e-2, rtol=1e-2)
    assert jnp.allclose(c_new, ref_c, atol=1e-2, rtol=1e-2)

    print("KERNEL_OK")
</pallas_src>

<mosaic_0001>
module attributes {stable_mosaic.version = 11 : i64} {
  func.func @_fused_lstm_kernel(%arg0: i32, %arg1: memref<2x16xf32, #tpu.memory_space<vmem>>, %arg2: memref<1x2x32xf32, #tpu.memory_space<vmem>>, %arg3: memref<1x2x32xf32, #tpu.memory_space<vmem>>, %arg4: memref<1x64x128xbf16, #tpu.memory_space<vmem>>, %arg5: memref<1x1x128xf32, #tpu.memory_space<vmem>>, %arg6: memref<1x2x32xf32, #tpu.memory_space<vmem>>, %arg7: memref<1x2x32xf32, #tpu.memory_space<vmem>>, %arg8: memref<2x32xf32, #tpu.memory_space<vmem>>, %arg9: memref<2x64xf32, #tpu.memory_space<vmem>>) attributes {dimension_semantics = [#tpu.dimension_semantics<arbitrary>], iteration_bounds = array<i64: 2>, scalar_prefetch = 0 : i64, scratch_operands = 1 : i64, tpu.core_type = #tpu.core_type<tc>, window_params = [{pipeline_mode = #tpu.pipeline_mode<synchronous>, transform_indices = @transform_0, window_bounds = array<i64: 2, 16>}, {transform_indices = @transform_1, window_bounds = array<i64: 1, 2, 32>}, {transform_indices = @transform_2, window_bounds = array<i64: 1, 2, 32>}, {transform_indices = @transform_3, window_bounds = array<i64: 1, 64, 128>}, {transform_indices = @transform_4, window_bounds = array<i64: 1, 1, 128>}, {transform_indices = @transform_5, window_bounds = array<i64: 1, 2, 32>}, {transform_indices = @transform_6, window_bounds = array<i64: 1, 2, 32>}, {pipeline_mode = #tpu.pipeline_mode<synchronous>, transform_indices = @transform_7, window_bounds = array<i64: 2, 32>}]} {
    %c0_i32 = arith.constant 0 : i32
    %0 = arith.cmpi eq, %arg0, %c0_i32 : i32
    %1 = arith.extui %0 : i1 to i32
    %c0_i32_0 = arith.constant 0 : i32
    %2 = arith.cmpi ne, %1, %c0_i32_0 : i32
    scf.if %2 {
      %cst_26 = arith.constant 0.000000e+00 : f32
      %40 = vector.broadcast %cst_26 : f32 to vector<2x64xf32>
      %c0_27 = arith.constant 0 : index
      %c0_28 = arith.constant 0 : index
      %41 = vector.load %arg9[%c0_27, %c0_28] : memref<2x64xf32, #tpu.memory_space<vmem>>, vector<2x64xf32>
      tpu.vector_store %arg9[%c0_27, %c0_28], %40 {strides = array<i32>} : memref<2x64xf32, #tpu.memory_space<vmem>>, vector<2x64xf32>,
      %c0_29 = arith.constant 0 : index
      %c0_30 = arith.constant 0 : index
      %42 = vector.load %arg1[%c0_29, %c0_30] : memref<2x16xf32, #tpu.memory_space<vmem>>, vector<2x16xf32>
      %c0_31 = arith.constant 0 : index
      %c0_32 = arith.constant 0 : index
      %43 = vector.load %arg9[%c0_31, %c0_32] : memref<2x64xf32, #tpu.memory_space<vmem>>, vector<2x16xf32>
      tpu.vector_store %arg9[%c0_31, %c0_32], %42 {strides = array<i32>} : memref<2x64xf32, #tpu.memory_space<vmem>>, vector<2x16xf32>,
    } else {
    }
    %c0 = arith.constant 0 : index
    %c0_1 = arith.constant 0 : index
    %c0_2 = arith.constant 0 : index
    %3 = vector.load %arg2[%c0, %c0_1, %c0_2] : memref<1x2x32xf32, #tpu.memory_space<vmem>>, vector<1x2x32xf32>
    %4 = vector.shape_cast %3 : vector<1x2x32xf32> to vector<2x32xf32>
    %c0_3 = arith.constant 0 : index
    %c32 = arith.constant 32 : index
    %5 = vector.load %arg9[%c0_3, %c32] : memref<2x64xf32, #tpu.memory_space<vmem>>, vector<2x32xf32>
    tpu.vector_store %arg9[%c0_3, %c32], %4 {strides = array<i32>} : memref<2x64xf32, #tpu.memory_space<vmem>>, vector<2x32xf32>,
    %c0_4 = arith.constant 0 : index
    %c0_5 = arith.constant 0 : index
    %6 = vector.load %arg9[%c0_4, %c0_5] : memref<2x64xf32, #tpu.memory_space<vmem>>, vector<2x64xf32>
    %7 = arith.truncf %6 : vector<2x64xf32> to vector<2x64xbf16>
    %c0_6 = arith.constant 0 : index
    %c0_7 = arith.constant 0 : index
    %c0_8 = arith.constant 0 : index
    %8 = vector.load %arg4[%c0_6, %c0_7, %c0_8] : memref<1x64x128xbf16, #tpu.memory_space<vmem>>, vector<1x64x128xbf16>
    %9 = vector.shape_cast %8 : vector<1x64x128xbf16> to vector<64x128xbf16>
    %cst = arith.constant dense<0.000000e+00> : vector<2x128xf32>
    %10 = tpu.matmul %7, %9, %cst {dimension_numbers = #tpu.dot_dimension_numbers<[1], [0], [0], [1], [0, 0, 1, 1], [], []>} : vector<2x64xbf16>, vector<64x128xbf16>, vector<2x128xf32> -> vector<2x128xf32>
    %c0_9 = arith.constant 0 : index
    %c0_10 = arith.constant 0 : index
    %c0_11 = arith.constant 0 : index
    %11 = vector.load %arg5[%c0_9, %c0_10, %c0_11] : memref<1x1x128xf32, #tpu.memory_space<vmem>>, vector<1x1x128xf32>
    %12 = vector.shape_cast %11 : vector<1x1x128xf32> to vector<1x128xf32>
    %13 = vector.broadcast %12 : vector<1x128xf32> to vector<2x128xf32>
    %14 = arith.addf %10, %13 : vector<2x128xf32>
    %15 = arith.negf %14 : vector<2x128xf32>
    %16 = math.exp %15 : vector<2x128xf32>
    %cst_12 = arith.constant 1.000000e+00 : f32
    %17 = vector.broadcast %cst_12 : f32 to vector<2x128xf32>
    %18 = arith.addf %17, %16 : vector<2x128xf32>
    %19 = arith.divf %17, %18 : vector<2x128xf32>
    %20 = vector.extract_strided_slice %14 {offsets = [0, 64], sizes = [2, 32], strides = [1, 1]} : vector<2x128xf32> to vector<2x32xf32>
    %21 = math.tanh %20 : vector<2x32xf32>
    %22 = vector.extract_strided_slice %19 {offsets = [0, 0], sizes = [2, 32], strides = [1, 1]} : vector<2x128xf32> to vector<2x32xf32>
    %23 = vector.extract_strided_slice %19 {offsets = [0, 32], sizes = [2, 32], strides = [1, 1]} : vector<2x128xf32> to vector<2x32xf32>
    %24 = vector.extract_strided_slice %19 {offsets = [0, 96], sizes = [2, 32], strides = [1, 1]} : vector<2x128xf32> to vector<2x32xf32>
    %c0_13 = arith.constant 0 : index
    %c0_14 = arith.constant 0 : index
    %c0_15 = arith.constant 0 : index
    %25 = vector.load %arg3[%c0_13, %c0_14, %c0_15] : memref<1x2x32xf32, #tpu.memory_space<vmem>>, vector<1x2x32xf32>
    %26 = vector.shape_cast %25 : vector<1x2x32xf32> to vector<2x32xf32>
    %27 = arith.mulf %23, %26 : vector<2x32xf32>
    %28 = arith.mulf %22, %21 : vector<2x32xf32>
    %29 = arith.addf %27, %28 : vector<2x32xf32>
    %30 = math.tanh %29 : vector<2x32xf32>
    %31 = arith.mulf %24, %30 : vector<2x32xf32>
    %c0_16 = arith.constant 0 : index
    %c0_17 = arith.constant 0 : index
    %c0_18 = arith.constant 0 : index
    %32 = vector.load %arg6[%c0_16, %c0_17, %c0_18] : memref<1x2x32xf32, #tpu.memory_space<vmem>>, vector<1x2x32xf32>
    %33 = vector.shape_cast %32 : vector<1x2x32xf32> to vector<2x32xf32>
    %34 = vector.shape_cast %31 : vector<2x32xf32> to vector<1x2x32xf32>
    tpu.vector_store %arg6[%c0_16, %c0_17, %c0_18], %34 {strides = array<i32>} : memref<1x2x32xf32, #tpu.memory_space<vmem>>, vector<1x2x32xf32>,
    %c0_19 = arith.constant 0 : index
    %c0_20 = arith.constant 0 : index
    %c0_21 = arith.constant 0 : index
    %35 = vector.load %arg7[%c0_19, %c0_20, %c0_21] : memref<1x2x32xf32, #tpu.memory_space<vmem>>, vector<1x2x32xf32>
    %36 = vector.shape_cast %35 : vector<1x2x32xf32> to vector<2x32xf32>
    %37 = vector.shape_cast %29 : vector<2x32xf32> to vector<1x2x32xf32>
    tpu.vector_store %arg7[%c0_19, %c0_20, %c0_21], %37 {strides = array<i32>} : memref<1x2x32xf32, #tpu.memory_space<vmem>>, vector<1x2x32xf32>,
    %c0_22 = arith.constant 0 : index
    %c0_23 = arith.constant 0 : index
    %38 = vector.load %arg8[%c0_22, %c0_23] : memref<2x32xf32, #tpu.memory_space<vmem>>, vector<2x32xf32>
    tpu.vector_store %arg8[%c0_22, %c0_23], %31 {strides = array<i32>} : memref<2x32xf32, #tpu.memory_space<vmem>>, vector<2x32xf32>,
    %c0_24 = arith.constant 0 : index
    %c0_25 = arith.constant 0 : index
    %39 = vector.load %arg9[%c0_24, %c0_25] : memref<2x64xf32, #tpu.memory_space<vmem>>, vector<2x32xf32>
    tpu.vector_store %arg9[%c0_24, %c0_25], %31 {strides = array<i32>} : memref<2x64xf32, #tpu.memory_space<vmem>>, vector<2x32xf32>,
    return
  }
  func.func @transform_0(%arg0: i32) -> (i32, i32) {
    %c0_i32 = arith.constant 0 : i32
    %c0_i32_0 = arith.constant 0 : i32
    %c0_i32_1 = arith.constant 0 : i32
    return %c0_i32, %c0_i32_0 : i32, i32
  }
  func.func @transform_1(%arg0: i32) -> (i32, i32, i32) {
    %c0_i32 = arith.constant 0 : i32
    %c0_i32_0 = arith.constant 0 : i32
    %c0_i32_1 = arith.constant 0 : i32
    return %arg0, %c0_i32, %c0_i32_0 : i32, i32, i32
  }
  func.func @transform_2(%arg0: i32) -> (i32, i32, i32) {
    %c0_i32 = arith.constant 0 : i32
    %c0_i32_0 = arith.constant 0 : i32
    %c0_i32_1 = arith.constant 0 : i32
    return %arg0, %c0_i32, %c0_i32_0 : i32, i32, i32
  }
  func.func @transform_3(%arg0: i32) -> (i32, i32, i32) {
    %c0_i32 = arith.constant 0 : i32
    %c0_i32_0 = arith.constant 0 : i32
    %c0_i32_1 = arith.constant 0 : i32
    return %arg0, %c0_i32, %c0_i32_0 : i32, i32, i32
  }
  func.func @transform_4(%arg0: i32) -> (i32, i32, i32) {
    %c0_i32 = arith.constant 0 : i32
    %c0_i32_0 = arith.constant 0 : i32
    %c0_i32_1 = arith.constant 0 : i32
    return %arg0, %c0_i32, %c0_i32_0 : i32, i32, i32
  }
  func.func @transform_5(%arg0: i32) -> (i32, i32, i32) {
    %c0_i32 = arith.constant 0 : i32
    %c0_i32_0 = arith.constant 0 : i32
    %c0_i32_1 = arith.constant 0 : i32
    return %arg0, %c0_i32, %c0_i32_0 : i32, i32, i32
  }
  func.func @transform_6(%arg0: i32) -> (i32, i32, i32) {
    %c0_i32 = arith.constant 0 : i32
    %c0_i32_0 = arith.constant 0 : i32
    %c0_i32_1 = arith.constant 0 : i32
    return %arg0, %c0_i32, %c0_i32_0 : i32, i32, i32
  }
  func.func @transform_7(%arg0: i32) -> (i32, i32) {
    %c0_i32 = arith.constant 0 : i32
    %c0_i32_0 = arith.constant 0 : i32
    %c0_i32_1 = arith.constant 0 : i32
    return %c0_i32, %c0_i32_0 : i32, i32
  }
}

</mosaic_0001>

<bundles_post_ra>
// kernel: _lstm_controller_step.1
= control target key start
LH: loop header
LB: loop body
LE: loop exit
PB: predicated region body
PF: predicated region fallthrough
CT: control target
= control target key end

     0   :  { %s1490_s0 = inlined_call_operand.hbm [shape: f32[2,16], index: 0, kind: input, shape index: {}]   ;;  %s1491_s1 = inlined_call_operand.hbm [shape: f32[2,2,32], index: 1, kind: input, shape index: {}, may-alias: {1,5}]   ;;  %s1492_s2 = inlined_call_operand.hbm [shape: f32[2,2,32], index: 2, kind: input, shape index: {}, may-alias: {2,6}]   ;;  %s1493_s3 = inlined_call_operand.hbm [shape: bf16[2,64,128], index: 3, kind: input, shape index: {}]   ;;  %s1494_s4 = inlined_call_operand.vmem [shape: f32[2,1,128], index: 4, kind: input, shape index: {}]   ;;  %s1495_s5 = inlined_call_operand.hbm [shape: f32[2,2,32], index: 5, kind: output, shape index: {0}, may-alias: {1,5}]   ;;  %s1496_s6 = inlined_call_operand.hbm [shape: f32[2,2,32], index: 6, kind: output, shape index: {1}, may-alias: {2,6}]   ;;  %s1497_s7 = inlined_call_operand.hbm [shape: f32[2,32], index: 7, kind: output, shape index: {2}]  }
   0x1   :  { %1505 = sst [smem:[#allocation25_spill]] %s1490_s0 }
   0x2   :  { %1506 = sst [smem:[#allocation26_spill]] %s1491_s1 }
   0x3   :  { %1507 = sst [smem:[#allocation27_spill]] %s1492_s2 }
   0x4   :  { %13 = vsyncpa [#allocation4], 0 }
   0x5   :  { %14 = vsyncpa [#allocation7], 0 }
   0x6   :  { %16 = vsyncpa [#allocation7 + $0x1], 0 }
   0x7   :  { %17 = vsyncpa [#allocation10], 0 }
   0x8   :  { %19 = vsyncpa [#allocation10 + $0x1], 0 }
   0x9   :  { %20 = vsyncpa [#allocation5], 0 }
   0xa   :  { %22 = vsyncpa [#allocation5 + $0x1], 0 }
   0xb   :  { %23 = vsyncpa [#allocation13], 0 }
   0xc   :  { %25 = vsyncpa [#allocation13 + $0x1], 0  ;;  %s1215_s24 = smov 0   ;;  %s1217_s25 = smov 0  }
   0xd   :  { %s1219_s26 = smov 0   ;;  %s1221_s27 = smov 0  }
   0xe LB: > { %1508 = sst [smem:[#allocation21_spill]] %s1161_s26  ;;  %s1236_s28 = sadd.s32 1, %s1165_s27   ;;  %s1165_s27 = sphi %s1221_s27, %s1530_s27   ;;  %s1161_s26 = sphi %s1219_s26, %s1532_s26   ;;  %s1157_s25 = sphi %s1217_s25, %s1534_s25   ;;  %s1153_s24 = sphi %s1215_s24, %s1533_s24  }
   0xf   : > { %1509 = sst [smem:[#allocation22_spill]] %s1236_s28  ;;  %s59_s29 = sadd.s32 1, %s1161_s26 }
  0x10   : > { %s56_s30 = ssub.s32 %s1165_s27, %s1236_s28  ;;  %p66_p0 = scmp.ne.s32.totalorder %s1161_s26, %s1157_s25 }
  0x11   : > { %p57_p1 = scmp.eq.s32.totalorder %s56_s30, 0  ;;  %p67_p2 = scmp.eq.s32.totalorder %s1165_s27, 0 }
  0x12   : > { %p853_p4 = scmp.lt.s32.totalorder %s1165_s27, 2  ;;  %s259_s9 = sand.u32 1, %s1165_s27  }
  0x13   : > { %s1247_s8 = scalar_select %p57_p1, %s1161_s26, %s59_s29  }
  0x14   : > { %p68_p5 = por %p67_p2, %p66_p0  ;;  %s1254_s10 = sand.u32 1, %s1161_s26  }
  0x15   : > { %1510 = sst [smem:[#allocation23_spill]] %s1247_s8  ;;  %s767_s11 = sshll.u32 %s1254_s10, 1 }
  0x16   : > { %s768_s12 = sshll.u32 %s1165_s27, 1  ;;  %s1511_s1 = sld [smem:[#allocation26_spill]] }
  0x17   : > { %s263_s17 = scalar_lea.vmem [#allocation6], %s767_s11  ;;  %p1265_p6 = pnand %p853_p4, %p68_p5 }
  0x18   : > { %s271_s18 = sshll.u32 %s263_s17, 4  ;;  %s1513_s2 = sld [smem:[#allocation27_spill]]  ;;  %s272_s18 = int_to_ptr.vmem [resolvable:$true] %s271_s18 }
  0x19   : > { %s1274_s23 = scalar_lea.sflag [#allocation7], %s259_s9  ;;  %p911_p8 = pneg %p1265_p6 }
  0x1c   : > { %s267_s15 = scalar_lea.hbm %s1511_s1, %s768_s12 }
  0x1d   : > { %s269_s16 = sshll.u32 %s267_s15, 4  ;;  %s914_s15 = scalar_lea.hbm %s1511_s1, 4  ;;  %s270_s16 = int_to_ptr.hbm [resolvable:$true] %s269_s16 }
  0x1e   : > { %s1272_s22 = scalar_lea.hbm %s1513_s2, %s768_s12  ;;  %s907_s29 = sshra.s32 %s270_s16, 4  ;;  %s908_s29 = int_to_ptr.hbm [resolvable:$true] %s907_s29 }
  0x1f   : > { %s909_s30 = scalar_lea.hbm %s908_s29, 2  ;;  %p915_p11 = scmp.lt.s32.totalorder %s908_s29, %s1511_s1 }
  0x20   : > { %p910_p7 = scmp.ne.s32.totalorder %s908_s29, %s909_s30  ;;  %p916_p12 = scmp.lt.s32.totalorder %s914_s15, %s909_s30 }
  0x22   : > { %p912_p9 = pnand %p911_p8, %p910_p7  ;;  %p917_p13 = por %p916_p12, %p915_p11 }
  0x24   : > { %p913_p10 = pneg %p912_p9 }
  0x26   : > { %p918_p1 = pnand %p917_p13, %p913_p10 }
  0x28   : > { %921 = shalt.err (!%p918_p1)
}
  0x29   : > { %838 = dma.hbm_to_vmem [thread:$0]  (!%p1265_p6), %s270_s16, 32, %s272_s18, %s1274_s23  }
  0x2a   : > { %s1291_s9 = sadd.s32 4294967295, %s1165_s27   ;;  %s1498_s12 = sadd.s32 4294967294, %s1165_s27  }
  0x2b   : > { %p72_p2 = scmp.ne.s32.totalorder %s1157_s25, %s1153_s24  ;;  %p1500_p4 = scmp.eq.s32.totalorder %s1291_s9, 0 }
  0x2c   : > { %p1499_p5 = scmp.eq.s32.totalorder %s1291_s9, 1  ;;  %p180_p7 = scmp.eq.s32.totalorder %s1498_s12, 1 }
  0x2d   : > { %p1302_p9 = por %p1500_p4, %p72_p2  ;;  %p764_p10 = scmp.ge.s32.totalorder %s1165_s27, 1 }
  0x2e   : > { %p1312_p11 = por %p1499_p5, %p66_p0  ;;  %p1316_p12 = por %p180_p7, %p72_p2 }
  0x2f   : > { %p234_p13 = scmp.lt.s32.totalorder %s1165_s27, 3  ;;  %s1518_s0 = sld [smem:[#allocation25_spill]] }
  0x30   : > { %s1516_s18 = scalar_select %p1316_p12, 1, 0 }
  0x31   : > { %p1325_p3 = pnand %p764_p10, %p234_p13  ;;  %s1167_s15 = smov [#allocation3]  }
  0x32   : > { %1517 = sst [smem:[#allocation24_spill]] %s1516_s18  ;;  %s248_s17 = sshll.u32 %s1167_s15, 4  ;;  %s249_s17 = int_to_ptr.vmem [resolvable:$true] %s248_s17 }
  0x33   : > { %s288_s20 = sshll.u32 %s1272_s22, 4  ;;  %p831_p0 = pneg %p1325_p3  ;;  %s289_s20 = int_to_ptr.hbm [resolvable:$true] %s288_s20 }
  0x34   : > { %s282_s12 = scalar_lea.vmem [#allocation8], %s767_s11  ;;  %s937_s30 = sshra.s32 %s289_s20, 4  ;;  %s938_s30 = int_to_ptr.hbm [resolvable:$true] %s937_s30 }
  0x35   : > { %s246_s13 = sshll.u32 %s1518_s0, 4  ;;  %s290_s1 = sshll.u32 %s282_s12, 4  ;;  %s247_s13 = int_to_ptr.hbm [resolvable:$true] %s246_s13  ;;  %s291_s1 = int_to_ptr.vmem [resolvable:$true] %s290_s1 }
  0x36   : > { %p1336_p2 = pnand %p831_p0, %p1500_p4  ;;  %s939_s0 = scalar_lea.hbm %s938_s30, 2 }
  0x37   : > { %p940_p7 = scmp.ne.s32.totalorder %s938_s30, %s939_s0  ;;  %s944_s8 = scalar_lea.hbm %s1513_s2, 4 }
  0x38   : > { %p945_p0 = scmp.lt.s32.totalorder %s938_s30, %s1513_s2  ;;  %p946_p5 = scmp.lt.s32.totalorder %s944_s8, %s939_s0 }
  0x39   : > { %p942_p10 = pnand %p940_p7, %p911_p8 }
  0x3a   : > { %p947_p1 = por %p946_p5, %p945_p0 }
  0x3b   : > { %p943_p13 = pneg %p942_p10 }
  0x3d   : > { %p948_p4 = pnand %p947_p1, %p943_p13 }
  0x3f   : > { %951 = shalt.err (!%p948_p4)
}
  0x40   : > { %841 = dma.hbm_to_vmem [thread:$0]  (!%p1265_p6), %s289_s20, 32, %s291_s1, %s1274_s23  }
  0x41   : > { %834 = dma.hbm_to_vmem [thread:$0]  (!%p1336_p2), %s247_s13, 32, %s249_s17, [#allocation4]  }
  0x42   : > { %s771_s22 = sshll.u32 %s1254_s10, 5  ;;  %s808_s15 = sshll.u32 %s1165_s27, 5 }
  0x43   : > { %s306_s0 = scalar_lea.hbm %s1493_s3, %s808_s15  ;;  %s301_s30 = scalar_lea.vmem [#allocation9], %s771_s22 }
  0x44   : > { %s307_s8 = sshll.u32 %s306_s0, 4  ;;  %s309_s12 = sshll.u32 %s301_s30, 4  ;;  %s308_s8 = int_to_ptr.hbm [resolvable:$true] %s307_s8  ;;  %s310_s12 = int_to_ptr.vmem [resolvable:$true] %s309_s12 }
  0x45   : > { %s298_s2 = scalar_lea.sflag [#allocation10], %s1254_s10  ;;  %s997_s28 = sshra.s32 %s308_s8, 4  ;;  %s998_s28 = int_to_ptr.hbm [resolvable:$true] %s997_s28 }
  0x46   : > { %s999_s18 = scalar_lea.hbm %s998_s28, 32  ;;  %s1004_s13 = scalar_lea.hbm %s1493_s3, 64 }
  0x47   : > { %p1000_p4 = scmp.ne.s32.totalorder %s998_s28, %s999_s18  ;;  %p1005_p2 = scmp.lt.s32.totalorder %s998_s28, %s1493_s3 }
  0x48   : > { %p1006_p7 = scmp.lt.s32.totalorder %s1004_s13, %s999_s18 }
  0x49   : > { %p1002_p5 = pnand %p1000_p4, %p911_p8 }
  0x4a   : > { %p1007_p10 = por %p1006_p7, %p1005_p2 }
  0x4b   : > { %p1003_p1 = pneg %p1002_p5 }
  0x4d   : > { %p1008_p13 = pnand %p1007_p10, %p1003_p1 }
  0x4f   : > { %1011 = shalt.err (!%p1008_p13)
}
  0x50   : > { %s1168_s10 = smov 64   ;;  %s1169_s20 = smov 4  }
  0x51   : > { %844 = dma.hbm_to_vmem [thread:$0]  (!%p1265_p6), %s308_s8, 512, %s310_s12, %s298_s2, %s1168_s10, %s1168_s10, %s1169_s20  }
  0x52   : > { %327 = sbr.rel (%p1325_p3) target bundleno = 828 (0x33c), region = 40  ;;  %p1521_p8 = scmp.eq.s32.totalorder (!%p1325_p3), %s1291_s9, 0 }
  0x57   : > { %1128 = dma.done.wait (%p1521_p8), [#allocation4], 32   ;;  %p1522_p0 = pmov %p1521_p8 }
  0x58   : > { %s334_s28 = sand.u32 1, %s1291_s9   ;;  %s1379_s18 = sand.u32 1, %s1157_s25  }
  0x59   : > { %1130 = vsyncadd (%p1522_p0), [#allocation4], 4294967264  ;;  %s1382_s29 = sshll.u32 %s1379_s18, 1  ;;  %s335_s2 = scalar_lea.sflag [#allocation7], %s334_s28 }
  0x5a   : > { %s338_s19 = scalar_lea.vmem [#allocation6], %s1382_s29 }
  0x5b   : > { %1132 = dma.done.wait (%p1302_p9), %s335_s2, 64  }
  0x5c   : > { %1134 = vsyncadd (%p1302_p9), %s335_s2, 4294967232  ;;  %s778_s14 = sshll.u32 %s1379_s18, 5  ;;  %s348_s22 = scalar_lea.vmem [#allocation8], %s1382_s29 }
  0x5d   : > { %s355_s15 = scalar_lea.sflag [#allocation10], %s1379_s18  ;;  %s358_s11 = scalar_lea.vmem [#allocation9], %s778_s14 }
  0x5e   : > { %1136 = dma.done.wait (%p1302_p9), %s355_s15, 512  }
  0x5f   : > { %1138 = vsyncadd (%p1302_p9), %s355_s15, 4294966784  ;;  %p408_p3 = scmp.lt.s32.totalorder %s1291_s9, 1  ;;  %s398_s1 = scalar_lea.vmem [#allocation11], %s1382_s29 }
  0x60   : > { %s405_s23 = scalar_lea.vmem [#allocation12], %s1382_s29  ;;  %p1523_p6 = scmp.ne.s32.totalorder %s1291_s9, 0 }
  0x61   : > { %s1400_s0 = scalar_select %p408_p3, %s1291_s9, 1 }
  0x62   : > { %415 = sbr.rel (%p1523_p6) target bundleno = 106 (0x6a), region = 60 }
  0x63   : > { %s410_s12 = scalar_lea.vmem %s1494_s4, %s1400_s0 }
  0x67   : > { %vm416_vm0 = vcmask 517120   ;;  %v418_v0 = vld [vmem:[#allocation3] sm:$0x3]  ;;  %vm419_vm1 = vcmask 123904   ;;  %v1170_v1 = vmov 0.0  }
  0x68   : > { %417 = vst.msk [vmem:[#allocation2] sm:$0x3] %vm416_vm0, %v1170_v1 }
  0x69   : > { %420 = vst.msk [vmem:[#allocation2] sm:$0x3] %vm419_vm1, %v418_v0 }
  0x6a PF: > { %v421_v2 = vld [vmem:[%s338_s19] sm:$0x3]  ;;  %s1171_s21 = smov 32   ;;  %v811_v4 = vld [vmem:[%s358_s11 + $0x10] sm:$0xff]  ;;  %v810_v5 = vld [vmem:[%s358_s11 + $0x8] sm:$0xff]  ;;  %vm426_vm2 = vcmask 517376  }
  0x6b   : > { %v812_v3 = vld [vmem:[%s358_s11 + $0x18] sm:$0xff]  ;;  %423 = vrot.lane.b32.xlu0 %v421_v2, %s1171_s21  ;;  %v809_v6 = vld [vmem:[%s358_s11] sm:$0xff]  ;;  %vm466_vm3 = vcmask 523264   ;;  %v898_v11 = vld [vmem:[%s410_s12] ss:$0 sm:$0xff]  ;;  %s1172_s17 = smov 64  }
  0x6c   : > { %474 = vmatpush.bf16.msra.mxu0 %v812_v3  ;;  %v503_v7 = vld [vmem:[%s348_s22] sm:$0x3]  ;;  %s1173_s10 = smov 96   ;;  %s802_s20 = sshll.u32 %s1291_s9, 1  ;;  %vm529_vm8 = vcmask 254976  }
  0x6d   : > { %505 = vrot.lane.b32.xlu1 %v503_v7, %s1171_s21  ;;  %s568_s14 = scalar_lea.hbm %s1496_s6, %s802_s20  ;;  %s570_s22 = sshll.u32 %s405_s23, 4  ;;  %s571_s22 = int_to_ptr.vmem [resolvable:$true] %s570_s22 }
  0x6e   : > { %s572_s15 = sshll.u32 %s568_s14, 4  ;;  %s544_s11 = scalar_lea.sflag [#allocation13], %s334_s28  ;;  %s573_s15 = int_to_ptr.hbm [resolvable:$true] %s572_s15 }
  0x6f   : > { %s1041_s0 = sshra.s32 %s573_s15, 4  ;;  %s1042_s0 = int_to_ptr.hbm [resolvable:$true] %s1041_s0 }
  0x70   : > { %475 = vmatpush.bf16.msra.mxu0 %v811_v4  ;;  %s1043_s8 = scalar_lea.hbm %s1042_s0, 2  ;;  %p1048_p1 = scmp.lt.s32.totalorder %s1042_s0, %s1496_s6 }
  0x71   : > { %p1044_p9 = scmp.ne.s32.totalorder %s1042_s0, %s1043_s8 }
  0x73   : > { %p1045_p4 = pnand %p1044_p9, %p1312_p11 }
  0x74   : > { %476 = vmatpush.bf16.msra.mxu0 %v810_v5 }
  0x75   : > { %p1046_p5 = pneg %p1045_p4 }
  0x78   : > { %477 = vmatpush.bf16.msra.mxu0 %v809_v6 }
  0xdd   : > { %v424_v8 = vpop.permute.xlu0 %423 }
  0xde   : > { %427 = vst.msk [vmem:[#allocation2] sm:$0x3] %vm426_vm2, %v424_v8 }
  0xdf   : > { %v506_v31 = vpop.permute.xlu1 %505 }
  0xe5   : > { %v428_v9 = vld [vmem:[#allocation2] sm:$0x3] }
  0xe6   : > { %v429_v10 = vpack.c.bf16 %v428_v9, %v428_v9 }
  0xe8   : > { %798 = vmatmul.msk.bf16.vlgmr.msra.gmra.mxu0 %vm466_vm3, %v429_v10 }
 0x165   : > { %v479_v12 = vpop.f32.mrf.mxu0 }
 0x166   : > { %v480_v13 = vadd.f32 %v898_v11, %v479_v12 }
 0x168   : > { %899 = vtanh.f32 %v480_v13  ;;  %v799_v16 = vmul.f32 -1.442695, %v480_v13 }
 0x16a   : > { %901 = vpow2.f32 %v799_v16 }
 0x16d   : > { %v481_v14 = vpop.f32.mrf.mxu0 }
 0x16e   : > { %v900_v15 = vpop.eup %899 }
 0x16f   : > { %510 = vrot.lane.b32.xlu0 %v900_v15, %s1172_s17 }
 0x170   : > { %v902_v17 = vpop.eup %901 }
 0x171   : > { %v486_v18 = vadd.f32 1.0, %v902_v17 }
 0x173   : > { %903 = vrcp.f32 %v486_v18  ;;  %v498_v24 = vand.u32 2147483648, %v486_v18  ;;  %vm492_vm5 = vweird.f32 %v486_v18  ;;  %v496_v25 = vand.u32 2147483647, %v486_v18 }
 0x175   : > { %v499_v27 = vor.u32 1.1754944e-38, %v498_v24  ;;  %vm497_vm7 = vcmp.eq.f32.partialorder %v496_v25, 8.507059e+37 }
 0x179   : > { %v904_v19 = vpop.eup %903 }
 0x17a   : > { %v488_v20 = vmul.f32 %v904_v19, %v486_v18  ;;  %vm493_vm4 = vweird.f32 %v904_v19 }
 0x17b   : > { %vm494_vm6 = vmor %vm492_vm5, %vm493_vm4 }
 0x17c   : > { %v489_v21 = vsub.f32 1.0, %v488_v20 }
 0x17e   : > { %v490_v22 = vmul.f32 %v904_v19, %v489_v21 }
 0x180   : > { %v491_v23 = vadd.f32 %v904_v19, %v490_v22 }
 0x182   : > { %v495_v26 = vsel %vm494_vm6, %v904_v19, %v491_v23 }
 0x183   : > { %v500_v28 = vsel %vm497_vm7, %v499_v27, %v495_v26 }
 0x184   : > { %v508_v32 = vmul.f32 %v506_v31, %v500_v28 }
 0x1e1   : > { %v511_v29 = vpop.permute.xlu0 %510 }
 0x1e2   : > { %v513_v30 = vmul.f32 %v511_v29, %v500_v28 }
 0x1e4   : > { %515 = vrot.lane.b32.xlu1 %v513_v30, %s1171_s21 }
 0x256   : > { %v516_v33 = vpop.permute.xlu1 %515 }
 0x257   : > { %v518_v34 = vadd.f32 %v516_v33, %v508_v32 }
 0x259   : > { %905 = vtanh.f32 %v518_v34 }
 0x25f   : > { %v906_v35 = vpop.eup %905 }
 0x260   : > { %521 = vrot.lane.b32.xlu2 %v906_v35, %s1172_s17 }
 0x268   : > { %532 = vrot.lane.b32.xlu2 %v518_v34, %s1173_s10 }
 0x2ba   : > { %v522_v36 = vpop.permute.xlu2 %521 }
 0x2bb   : > { %v524_v37 = vmul.f32 %v522_v36, %v500_v28 }
 0x2bd   : > { %526 = vrot.lane.b32.xlu0 %v524_v37, %s1171_s21  ;;  %s1047_s21 = scalar_lea.hbm %s1496_s6, 4 }
 0x2be   : > { %p1049_p2 = scmp.lt.s32.totalorder %s1047_s21, %s1043_s8 }
 0x2c0   : > { %p1050_p7 = por %p1049_p2, %p1048_p1 }
 0x2c2   : > { %v533_v38 = vpop.permute.xlu2 %532  ;;  %p1051_p10 = pnand %p1050_p7, %p1046_p5 }
 0x2c3   : > { %535 = vst.msk [vmem:[%s405_s23] sm:$0x3] %vm529_vm8, %v533_v38 }
 0x2c4   : > { %1054 = shalt.err (!%p1051_p10)
}
 0x2c5   : > { %824 = dma.vmem_to_hbm [thread:$0]  (%p1312_p11), %s571_s22, 32, %s573_s15, %s544_s11  }
 0x2c6   : > { %s554_s17 = scalar_lea.hbm %s1495_s5, %s802_s20  ;;  %s556_s10 = sshll.u32 %s398_s1, 4  ;;  %s557_s10 = int_to_ptr.vmem [resolvable:$true] %s556_s10 }
 0x2c7   : > { %s558_s2 = sshll.u32 %s554_s17, 4  ;;  %s1174_s19 = smov [#allocation14]   ;;  %s559_s2 = int_to_ptr.hbm [resolvable:$true] %s558_s2 }
 0x2c8   : > { %s582_s14 = sshll.u32 %s1174_s19, 4  ;;  %s584_s30 = sshll.u32 %s1497_s7, 4  ;;  %s583_s14 = int_to_ptr.vmem [resolvable:$true] %s582_s14  ;;  %s585_s30 = int_to_ptr.hbm [resolvable:$true] %s584_s30 }
 0x2c9   : > { %s539_s20 = scalar_lea.sflag [#allocation5], %s1379_s18  ;;  %s1069_s22 = sshra.s32 %s559_s2, 4  ;;  %s1070_s22 = int_to_ptr.hbm [resolvable:$true] %s1069_s22 }
 0x2ca   : > { %s1071_s15 = scalar_lea.hbm %s1070_s22, 2  ;;  %s1075_s21 = scalar_lea.hbm %s1495_s5, 4 }
 0x2cb   : > { %p1072_p13 = scmp.ne.s32.totalorder %s1070_s22, %s1071_s15  ;;  %p1076_p3 = scmp.lt.s32.totalorder %s1070_s22, %s1495_s5 }
 0x2cc   : > { %p1077_p6 = scmp.lt.s32.totalorder %s1075_s21, %s1071_s15 }
 0x2cd   : > { %p1073_p8 = pnand %p1072_p13, %p1312_p11 }
 0x2ce   : > { %p1078_p9 = por %p1077_p6, %p1076_p3 }
 0x2cf   : > { %p1074_p0 = pneg %p1073_p8 }
 0x2d1   : > { %p1079_p4 = pnand %p1078_p9, %p1074_p0 }
 0x32f   : > { %v527_v39 = vpop.permute.xlu0 %526 }
 0x330   : > { %530 = vst.msk [vmem:[%s398_s1] sm:$0x3] %vm529_vm8, %v527_v39 }
 0x331   : > { %536 = vst.msk [vmem:[#allocation14] sm:$0x3] %vm529_vm8, %v527_v39 }
 0x332   : > { %1082 = shalt.err (!%p1079_p4)
}
 0x333   : > { %823 = dma.vmem_to_hbm [thread:$0]  (%p1312_p11), %s557_s10, 32, %s559_s2, %s539_s20   ;;  %537 = vst.msk [vmem:[#allocation2] sm:$0x3] %vm529_vm8, %v527_v39 }
 0x334   : > { %p1524_p5 = scmp.eq.s32.totalorder %s1291_s9, 1 }
 0x336   : > { %826 = dma.vmem_to_hbm [thread:$0]  (%p1524_p5), %s583_s14, 32, %s585_s30, [#allocation13]  }
 0x337   : > { %p1525_p1 = pmov %p1524_p5 }
 0x339   : > { %1140 = dma.done.wait (%p1525_p1), [#allocation13], 32   ;;  %p1526_p2 = pmov %p1525_p1 }
 0x33b   : > { %1142 = vsyncadd (%p1526_p2), [#allocation13], 4294967264 }
 0x33c PF: > { %s601_s29 = sand.u32 1, %s1153_s24   ;;  %p1528_p7 = scmp.ge.s32.totalorder %s1165_s27, 2 }
 0x33d   : > { %s602_s16 = scalar_lea.sflag [#allocation5], %s601_s29 }
 0x33e   : > { %p846_p10 = pnand %p1528_p7, %p1316_p12 }
 0x340   : > { %p847_p13 = pneg %p846_p10 }
 0x342   : > { %1144 = dma.done.wait (%p847_p13), %s602_s16, 32  }
 0x343   : > { %1146 = vsyncadd (%p847_p13), %s602_s16, 4294967264  ;;  %s1529_s1 = sadd.s32 4294967294, %s1165_s27  }
 0x344   : > { %s611_s28 = sand.u32 1, %s1529_s1  }
 0x345   : > { %s612_s23 = scalar_lea.sflag [#allocation13], %s611_s28 }
 0x346   : > { %1148 = dma.done.wait (%p847_p13), %s612_s23, 32  }
 0x347   : > { %1150 = vsyncadd (%p847_p13), %s612_s23, 4294967264  ;;  %s1530_s27 = sld [smem:[#allocation22_spill]]  ;;  %s1533_s24 = smov %s1157_s25 }
 0x348   : > { %s1531_s9 = sld [smem:[#allocation21_spill]] }
 0x349   : > { %s1532_s26 = sld [smem:[#allocation23_spill]] }
 0x34d   : > { %p28_p11 = scmp.ge.s32.totalorder %s1530_s27, 4  }
 0x34e   : > { %s1534_s25 = smov %s1531_s9 }
 0x34f   :  { %30 = sbr.rel (!%p28_p11) target bundleno = 14 (0xe), region = 146 }
 0x354   :  { %618 = vsyncpa [#allocation4], 1 }
 0x355   :  { %620 = vsyncpa [#allocation4 + $0x1], 1 }
 0x356   :  { %621 = vsyncpa [#allocation7], 1 }
 0x357   :  { %623 = vsyncpa [#allocation7 + $0x1], 1 }
 0x358   :  { %624 = vsyncpa [#allocation10], 1 }
 0x359   :  { %626 = vsyncpa [#allocation10 + $0x1], 1 }
 0x35a   :  { %627 = vsyncpa [#allocation5], 1 }
 0x35b   :  { %629 = vsyncpa [#allocation5 + $0x1], 1 }
 0x35c   :  { %630 = vsyncpa [#allocation13], 1 }
 0x35d   :  { %632 = vsyncpa [#allocation13 + $0x1], 1 }

</bundles_post_ra>
